<compile_context>
chip_gen: v6e
topology: v6e:2x2x1
jax: 0.10.0
libtpu: 0.0.40
codegen_flags: <defaults>
</compile_context>

<pallas_src>
import functools

import jax
import jax.numpy as jnp
from jax.experimental import pallas as pl
from jax.experimental.pallas import tpu as pltpu

# hyperparameters mirroring models.py (eval-mode forward)
LOG_STRENGTH_START = 0.0
BETA = 1.0
# TODO(synk): training-mode log_strength schedule (stateful increment per call)
# has no Pallas equivalent here; if b ever becomes learnable/runtime it must be
# passed as a scalar (SMEM / scalar prefetch) instead of baked as a constant.
B_CONST = BETA * max(1e-4, LOG_STRENGTH_START)   # = 1e-4
INV_B = 1.0 / B_CONST

_LANE_CHOICES = (4096, 2048, 1024, 512, 256, 128)   # widest lane-dense view first
_MIN_PALLAS_BYTES = 256 * 1024         # below this a fused XLA op beats a custom call
_SINGLE_BLOCK_MAX_BYTES = 512 * 1024   # above this, use the tiled/parallel path
_BLOCK_BYTES_TARGET = 4 * 1024 * 1024  # ~4 MiB per block (amortizes grid-step overhead)
# 2 input bufs + 2 output bufs at 4 MiB = 16 MiB, which is exactly v5e's scoped
# default -> raise the limit (well under v7x's 64 MiB physical VMEM).
_VMEM_LIMIT_BYTES = 40 * 1024 * 1024


def _relog_kernel(x_ref, o_ref):
    # relu + const-mul on the VALU, log1p on the EUP, const-mul on the VALU.
    # Multiplying by the Python-time constant 1/b (instead of dividing) keeps
    # the lone EUP slot free for log1p.  Python-float constants keep compute
    # in the storage dtype (bf16 stays native bf16 on v6e/v7x).
    x = x_ref[...]
    o_ref[...] = (jnp.log1p(B_CONST * jnp.maximum(x, 0.0)) * INV_B).astype(o_ref.dtype)


def _relog_jnp(x):
    # Fused XLA fallback (tiny inputs / <128-element tails).
    return jnp.log1p(B_CONST * jnp.maximum(x, 0.0)) * INV_B


def _relog_flat_aligned(flat):
    """Pallas ReLog on a 1-D array whose length is a multiple of 128."""
    total = flat.shape[0]
    itemsize = jnp.dtype(flat.dtype).itemsize
    nbytes = total * itemsize

    # Widest lane-dense last dim that divides the flat size (wide unmasked
    # stores, fewer grid steps); falls back to 128 for awkward factorizations.
    for lanes in _LANE_CHOICES:
        if total % lanes == 0:
            break
    rows = total // lanes
    x2d = flat.reshape(rows, lanes)

    cost = pl.CostEstimate(flops=3 * total, transcendentals=total,
                           bytes_accessed=2 * nbytes)

    if nbytes <= _SINGLE_BLOCK_MAX_BYTES or rows < 8:
        # Single whole-array VMEM block: one DMA in, one DMA out, no grid.
        out2d = pl.pallas_call(
            _relog_kernel,
            out_shape=jax.ShapeDtypeStruct((rows, lanes), flat.dtype),
            in_specs=[pl.BlockSpec(memory_space=pltpu.MemorySpace.VMEM)],
            out_specs=pl.BlockSpec(memory_space=pltpu.MemorySpace.VMEM),
            cost_estimate=cost,
        )(x2d)
    else:
        # Tiled path: ~4 MiB double-buffered blocks, parallel grid axis.
        # Partial final row-blocks are masked by Pallas (no explicit padding).
        row_bytes = lanes * itemsize
        row_tile = max(8, (_BLOCK_BYTES_TARGET // row_bytes) // 8 * 8)
        row_tile = min(row_tile, (rows // 8) * 8)
        out2d = pl.pallas_call(
            _relog_kernel,
            out_shape=jax.ShapeDtypeStruct((rows, lanes), flat.dtype),
            grid=(pl.cdiv(rows, row_tile),),
            in_specs=[pl.BlockSpec((row_tile, lanes), lambda i: (i, 0))],
            out_specs=pl.BlockSpec((row_tile, lanes), lambda i: (i, 0)),
            compiler_params=pltpu.CompilerParams(
                dimension_semantics=("parallel",),
                vmem_limit_bytes=_VMEM_LIMIT_BYTES,
            ),
            cost_estimate=cost,
        )(x2d)
        # NOTE: pipeline_mode=pl.Buffered(3) on the input spec is a further
        # option if profiling ever shows exposed DMA at this block size.
    return out2d.reshape(-1)


@functools.partial(jax.jit, static_argnames=("force_pallas",))
def relog(x, *, force_pallas=False):
    """Apply ReLog elementwise to an arbitrarily-shaped array."""
    total = x.size
    if total == 0:
        return x
    nbytes = total * jnp.dtype(x.dtype).itemsize
    if not force_pallas and nbytes < _MIN_PALLAS_BYTES:
        # Tiny tensors: a fused XLA elementwise op beats custom-call overhead.
        return _relog_jnp(x)

    rem = total % 128
    if rem == 0:
        return _relog_flat_aligned(x.reshape(-1)).reshape(x.shape)

    # Non-128-aligned flat size: run the aligned bulk through the kernel and
    # the (<128-element) tail through a fused jnp op -- no pad / slice HBM
    # round trips.
    flat = x.reshape(-1)
    bulk = total - rem
    if bulk == 0:
        return _relog_jnp(x)
    head = _relog_flat_aligned(flat[:bulk])
    tail = _relog_jnp(flat[bulk:])
    return jnp.concatenate([head, tail]).reshape(x.shape)


if __name__ == "__main__":
    key = jax.random.PRNGKey(0)
    k1, k2, k3 = jax.random.split(key, 3)

    # (1) Prescribed small NCHW input (2x4x16x16).  force_pallas=True so the
    #     Pallas kernel itself runs (default routing would use the fused-XLA
    #     tiny-input path per the perf review).
    x_small = jax.random.normal(k1, (2, 4, 16, 16), dtype=jnp.float32)
    out_small = jax.block_until_ready(relog(x_small, force_pallas=True))
    ref_small = jnp.log1p(B_CONST * jnp.maximum(x_small, 0.0)) / B_CONST
    assert out_small.shape == x_small.shape and out_small.dtype == x_small.dtype
    assert jnp.allclose(out_small, ref_small, rtol=1e-6, atol=1e-6)

    # Default routing (fused XLA for tiny inputs) must agree too.
    out_small_default = jax.block_until_ready(relog(x_small))
    assert jnp.allclose(out_small_default, ref_small, rtol=1e-6, atol=1e-6)

    # (2) Mid-size tensor -> tiled, lane-dense (512 x 4096 view), ~4 MiB blocks.
    x_mid = jax.random.normal(k2, (8, 64, 64, 64), dtype=jnp.float32)
    out_mid = jax.block_until_ready(relog(x_mid))
    ref_mid = jnp.log1p(B_CONST * jnp.maximum(x_mid, 0.0)) / B_CONST
    assert jnp.allclose(out_mid, ref_mid, rtol=1e-5, atol=1e-5)

    # (3) Non-128-aligned flat size -> Pallas on the aligned bulk + fused tail.
    x_odd = jax.random.normal(k3, (33, 65), dtype=jnp.float32)
    out_odd = jax.block_until_ready(relog(x_odd, force_pallas=True))
    ref_odd = jnp.log1p(B_CONST * jnp.maximum(x_odd, 0.0)) / B_CONST
    assert out_odd.shape == x_odd.shape
    assert jnp.allclose(out_odd, ref_odd, rtol=1e-6, atol=1e-6)

    print("KERNEL_OK")
</pallas_src>

<mosaic_0001>
module attributes {stable_mosaic.version = 11 : i64} {
  func.func @_relog_kernel(%arg0: memref<1x2048xf32, #tpu.memory_space<vmem>>, %arg1: memref<1x2048xf32, #tpu.memory_space<vmem>>) attributes {dimension_semantics = [], scalar_prefetch = 0 : i64, scratch_operands = 0 : i64, tpu.core_type = #tpu.core_type<tc>} {
    %c0 = arith.constant 0 : index
    %c0_0 = arith.constant 0 : index
    %0 = vector.load %arg0[%c0, %c0_0] : memref<1x2048xf32, #tpu.memory_space<vmem>>, vector<1x2048xf32>
    %cst = arith.constant 0.000000e+00 : f32
    %1 = vector.broadcast %cst : f32 to vector<1x2048xf32>
    %2 = arith.maximumf %0, %1 : vector<1x2048xf32>
    %cst_1 = arith.constant 9.99999974E-5 : f32
    %3 = vector.broadcast %cst_1 : f32 to vector<1x2048xf32>
    %4 = arith.mulf %3, %2 : vector<1x2048xf32>
    %5 = math.log1p %4 : vector<1x2048xf32>
    %cst_2 = arith.constant 1.000000e+04 : f32
    %6 = vector.broadcast %cst_2 : f32 to vector<1x2048xf32>
    %7 = arith.mulf %5, %6 : vector<1x2048xf32>
    %c0_3 = arith.constant 0 : index
    %c0_4 = arith.constant 0 : index
    %8 = vector.load %arg1[%c0_3, %c0_4] : memref<1x2048xf32, #tpu.memory_space<vmem>>, vector<1x2048xf32>
    tpu.vector_store %arg1[%c0_3, %c0_4], %7 {strides = array<i32>} : memref<1x2048xf32, #tpu.memory_space<vmem>>, vector<1x2048xf32>,
    return
  }
}

</mosaic_0001>

<bundles_post_ra>
// kernel: relog.1
= control target key start
LH: loop header
LB: loop body
LE: loop exit
PB: predicated region body
PF: predicated region fallthrough
CT: control target
= control target key end

     0   :  { %s66_s0 = inlined_call_operand.vmem [shape: f32[1,2048], index: 0, kind: input, shape index: {}]   ;;  %s67_s1 = inlined_call_operand.vmem [shape: f32[1,2048], index: 1, kind: output, shape index: {}]  }
   0x1   :  { %v8_v0 = vld [vmem:[%s66_s0] sm:$0xff]  ;;  %v9_v1 = vld [vmem:[%s66_s0 + $0x8] sm:$0xff] }
   0x2   :  { %v10_v2 = vmax.f32 %v8_v0, 0.0  ;;  %v11_v3 = vmax.f32 %v9_v1, 0.0 }
   0x4   :  { %v12_v4 = vmul.f32 0.0001, %v10_v2  ;;  %v13_v5 = vmul.f32 0.0001, %v11_v3 }
   0x6   :  { %v14_v6 = vadd.f32 1.0, %v12_v4  ;;  %v23_v7 = vadd.f32 1.0, %v13_v5  ;;  %v17_v8 = vmul.f32 -0.5, %v12_v4  ;;  %v26_v9 = vmul.f32 -0.5, %v13_v5 }
   0x7   :  { %v20_v11 = vand.u32 2147483647, %v12_v4  ;;  %v29_v13 = vand.u32 2147483647, %v13_v5 }
   0x8   :  { %40 = vlog2.f32 %v14_v6  ;;  %v18_v10 = vadd.f32 1.0, %v17_v8  ;;  %v27_v12 = vadd.f32 1.0, %v26_v9 }
   0x9   :  { %42 = vlog2.f32 %v23_v7  ;;  %vm21_vm0 = vcmp.lt.f32.partialorder %v20_v11, 0.0004427343  ;;  %vm30_vm1 = vcmp.lt.f32.partialorder %v29_v13, 0.0004427343 }
   0xa   :  { %v19_v14 = vmul.f32 %v18_v10, %v12_v4  ;;  %v28_v16 = vmul.f32 %v27_v12, %v13_v5 }
  0x15   :  { %v41_v15 = vpop.eup %40 }
  0x16   :  { %v43_v17 = vpop.eup %42  ;;  %v16_v18 = vmul.f32 0.6931472, %v41_v15 }
  0x17   :  { %v25_v19 = vmul.f32 0.6931472, %v43_v17 }
  0x18   :  { %v22_v20 = vsel %vm21_vm0, %v19_v14, %v16_v18 }
  0x19   :  { %v32_v21 = vmul.f32 10000.0, %v22_v20  ;;  %v31_v22 = vsel %vm30_vm1, %v28_v16, %v25_v19 }
  0x1a   :  { %v33_v23 = vmul.f32 10000.0, %v31_v22 }
  0x1b   :  { %34 = vst [vmem:[%s67_s1] sm:$0xff] %v32_v21 }
  0x1c   :  { %35 = vst [vmem:[%s67_s1 + $0x8] sm:$0xff] %v33_v23 }

</bundles_post_ra>
